<compile_context>
chip_gen: v7x
topology: tpu7x:2x2x1
jax: 0.10.0
libtpu: 0.0.40
codegen_flags: <defaults>
</compile_context>

<pallas_src>
import jax
import jax.numpy as jnp
import numpy as np
from jax.experimental import pallas as pl
from jax.experimental.pallas import tpu as pltpu


def _round_up(a: int, b: int) -> int:
    return ((a + b - 1) // b) * b


def _cdiv(a: int, b: int) -> int:
    return -(-a // b)


def _patch_embed_kernel(x_ref, w_ref, b_ref, o_ref):
    # x_ref: [tm, K] (compute dtype), w_ref: [K, E] (compute dtype),
    # b_ref: [1, E] (f32), o_ref: [tm, E] (output dtype)
    acc = jnp.dot(x_ref[...], w_ref[...], preferred_element_type=jnp.float32)
    o_ref[...] = (acc + b_ref[...]).astype(o_ref.dtype)


def patch_embedding(x, weight, bias, patch_size: int, *,
                    tile_m: int = 1024, compute_dtype=None):
    """Pallas implementation of PatchEmbedding.forward.

    Args:
      x:             [B, 1, C_in, L]  (the size-1 dim is squeezed, as in the module)
      weight:        [E, C_in, P]     (PyTorch Conv1d weight layout)
      bias:          [E]
      patch_size:    P (== Conv1d kernel_size == stride)
      tile_m:        requested row tile over the flattened B*N patch rows
      compute_dtype: dtype fed to the MXU. None (default) keeps the input dtype (f32,
                     matching PyTorch). jnp.bfloat16 (all gens) or an fp8 dtype (v7x)
                     reduces HBM bytes for inference; accumulation is always f32.
    Returns:
      [B, N, E] with N = L // P
    """
    B, one, C, L = x.shape
    assert one == 1, "dim 1 must be size 1 (matches x.squeeze(1))"
    E, Cw, P = weight.shape
    assert Cw == C and P == patch_size
    N = L // P                      # Conv1d semantics: trailing L % P samples are dropped
    M = B * N
    K = C * P

    out_dtype = x.dtype
    in_dtype = jnp.dtype(compute_dtype) if compute_dtype is not None else jnp.dtype(x.dtype)
    in_b = in_dtype.itemsize
    out_b = jnp.dtype(out_dtype).itemsize

    # VMEM-layout sizes (lane dim pads to 128 *inside VMEM only*; HBM stays unpadded).
    Kv = _round_up(K, 128)
    Ev = _round_up(E, 128)

    def _vmem_working_set(t):
        return (2 * t * Kv * in_b       # double-buffered activation tile
                + Kv * Ev * in_b        # weight (single-buffered, constant index_map)
                + 8 * Ev * 4            # bias (f32, sublane-padded)
                + 2 * t * Ev * out_b)   # double-buffered output tile

    # Generation-aware VMEM budget: v5e/v6e have 128 MiB physical VMEM, v7x only 64 MiB.
    try:
        vmem_cap = int(pltpu.get_tpu_info().vmem_capacity_bytes)
    except Exception:
        vmem_cap = 64 * 1024 * 1024     # conservative (v7x) if the query is unavailable
    budget = min(40 * 1024 * 1024, (3 * vmem_cap) // 5)

    # Row tile: multiple of 16 (bf16 packs 16 rows per sublane group); ensure >= 2 grid
    # steps when there is enough work (v7x shards the "parallel" axis over 2 TCs);
    # shrink until the working set fits the budget; a full-dim block is always legal.
    tm = max(16, (min(tile_m, _round_up(M, 16)) // 16) * 16)
    if M > 16:
        tm = min(tm, _round_up(_cdiv(M, 2), 16))
    while tm > 16 and _vmem_working_set(tm) > budget:
        tm = max(16, _round_up(tm // 2, 16))
    if tm > M:
        tm = M
    grid_m = _cdiv(M, tm)

    vmem_limit = int(min(max(2 * _vmem_working_set(tm), 32 * 1024 * 1024),
                         vmem_cap - 8 * 1024 * 1024))

    # ---- plain-JAX prep: ONE fused transpose + cast (no padding, no extra copies) ----
    # out[b,n,e] needs the activation as rows (b,n) x cols (c,p); the input arrives with
    # c major. Doing this reorder in-kernel would need either a (C,tn,P)->(tn,C*P) VMEM
    # relayout (XLU/store work exceeding the HBM bytes it saves) or P-deep MXU passes
    # (~P/256 MXU efficiency), so it stays here as a single XLA transpose+cast writing
    # compute-dtype bytes once.
    # TODO(synk): fuse this patchify reorder into the kernel's DMA once Mosaic exposes a
    #             cheap (C,tn,P)->(tn,C*P) relayout; it would save one activation-sized
    #             HBM round trip on this mem-bound op.
    xs = x[:, 0, :, : N * P]                      # [B, C, N*P]
    xs = xs.reshape(B, C, N, P)                   # [B, C, N, P]
    xs = jnp.transpose(xs, (0, 2, 1, 3))          # [B, N, C, P]
    xs = xs.reshape(M, K).astype(in_dtype)        # [M, K]   (unpadded)

    w = weight.reshape(E, K).T.astype(in_dtype)   # [K, E]   (sum over (c, p))
    b = bias.astype(jnp.float32).reshape(1, E)    # [1, E]

    # Honest (unpadded) traffic/flops so XLA schedules around the call correctly.
    cost = pl.CostEstimate(
        flops=2 * M * K * E,
        transcendentals=0,
        bytes_accessed=M * K * in_b + K * E * in_b + E * 4 + M * E * out_b,
    )

    def _make_call(single_buffer_consts: bool):
        const_kw = {"pipeline_mode": pl.Buffered(1)} if single_buffer_consts else {}
        return pl.pallas_call(
            _patch_embed_kernel,
            out_shape=jax.ShapeDtypeStruct((M, E), out_dtype),
            grid_spec=pltpu.PrefetchScalarGridSpec(
                num_scalar_prefetch=0,
                grid=(grid_m,),
                in_specs=[
                    pl.BlockSpec((tm, K), lambda i: (i, 0)),             # row tile
                    pl.BlockSpec((K, E), lambda i: (0, 0), **const_kw),  # shared weight
                    pl.BlockSpec((1, E), lambda i: (0, 0), **const_kw),  # shared bias
                ],
                out_specs=pl.BlockSpec((tm, E), lambda i: (i, 0)),
            ),
            compiler_params=pltpu.CompilerParams(
                dimension_semantics=("parallel",),
                vmem_limit_bytes=vmem_limit,
            ),
            cost_estimate=cost,
        )

    try:
        out = _make_call(True)(xs, w, b)
    except Exception:
        # Fallback for JAX versions that reject single-buffered (Buffered(1)) specs;
        # only cost is one extra resident weight/bias copy in VMEM.
        out = _make_call(False)(xs, w, b)

    return out.reshape(B, N, E)


def _reference(x, weight, bias, patch_size):
    # Pure-JAX reference of the same math (per-patch matmul == strided Conv1d).
    B, _, C, L = x.shape
    E = weight.shape[0]
    N = L // patch_size
    K = C * patch_size
    xs = x[:, 0, :, : N * patch_size].reshape(B, C, N, patch_size)
    xs = jnp.transpose(xs, (0, 2, 1, 3)).reshape(B, N, K)
    w = weight.reshape(E, K)
    return jnp.einsum("bnk,ek->bne", xs, w) + bias[None, None, :]


if __name__ == "__main__":
    # Small, module-consistent shapes: in_channels=8, patch_size=4, embed_dim=32.
    # L=45 exercises both the Conv1d trailing-sample drop (L % P != 0) and the masked
    # partial edge block (M = 22 rows, tile = 16 -> grid of 2 with a ragged last step).
    B, C_in, L = 2, 8, 45
    patch_size, embed_dim = 4, 32

    key = jax.random.PRNGKey(0)
    kx, kw, kb = jax.random.split(key, 3)

    x = jax.random.normal(kx, (B, 1, C_in, L), dtype=jnp.float32)
    # Deterministic synthetic Conv1d parameters (shapes from nn.Conv1d(C_in, E, P, P)).
    weight = jax.random.normal(kw, (embed_dim, C_in, patch_size), dtype=jnp.float32) * 0.02
    bias = jax.random.normal(kb, (embed_dim,), dtype=jnp.float32) * 0.02

    ref = _reference(x, weight, bias, patch_size)

    # Default path: f32 compute, matches the PyTorch module's Conv1d semantics.
    out_f32 = jax.block_until_ready(patch_embedding(x, weight, bias, patch_size))
    np.testing.assert_allclose(np.asarray(out_f32), np.asarray(ref), rtol=1e-5, atol=1e-5)

    # Optional bf16 path: MXU-native inputs, f32 accumulation + f32 epilogue.
    out_bf16 = jax.block_until_ready(
        patch_embedding(x, weight, bias, patch_size, compute_dtype=jnp.bfloat16))
    np.testing.assert_allclose(np.asarray(out_bf16), np.asarray(ref), rtol=2e-2, atol=2e-2)

    assert out_f32.shape == (B, L // patch_size, embed_dim)
    assert out_bf16.shape == (B, L // patch_size, embed_dim)

    print("KERNEL_OK")
</pallas_src>

<mosaic_0001>
module attributes {stable_mosaic.version = 11 : i64} {
  func.func @_patch_embed_kernel(%arg0: i32, %arg1: memref<16x32xf32, #tpu.memory_space<vmem>>, %arg2: memref<32x32xf32, #tpu.memory_space<vmem>>, %arg3: memref<1x32xf32, #tpu.memory_space<vmem>>, %arg4: memref<16x32xf32, #tpu.memory_space<vmem>>) attributes {dimension_semantics = [#tpu.dimension_semantics<parallel>], iteration_bounds = array<i64: 2>, scalar_prefetch = 0 : i64, scratch_operands = 0 : i64, tpu.core_type = #tpu.core_type<tc>, window_params = [{transform_indices = @transform_0, window_bounds = array<i64: 16, 32>}, {pipeline_mode = #tpu.pipeline_mode<synchronous>, transform_indices = @transform_1, window_bounds = array<i64: 32, 32>}, {pipeline_mode = #tpu.pipeline_mode<synchronous>, transform_indices = @transform_2, window_bounds = array<i64: 1, 32>}, {transform_indices = @transform_3, window_bounds = array<i64: 16, 32>}]} {
    %c0 = arith.constant 0 : index
    %c0_0 = arith.constant 0 : index
    %0 = vector.load %arg1[%c0, %c0_0] : memref<16x32xf32, #tpu.memory_space<vmem>>, vector<16x32xf32>
    %c0_1 = arith.constant 0 : index
    %c0_2 = arith.constant 0 : index
    %1 = vector.load %arg2[%c0_1, %c0_2] : memref<32x32xf32, #tpu.memory_space<vmem>>, vector<32x32xf32>
    %cst = arith.constant dense<0.000000e+00> : vector<16x32xf32>
    %2 = tpu.matmul %0, %1, %cst {dimension_numbers = #tpu.dot_dimension_numbers<[1], [0], [0], [1], [0, 0, 1, 1], [], []>} : vector<16x32xf32>, vector<32x32xf32>, vector<16x32xf32> -> vector<16x32xf32>
    %c0_3 = arith.constant 0 : index
    %c0_4 = arith.constant 0 : index
    %3 = vector.load %arg3[%c0_3, %c0_4] : memref<1x32xf32, #tpu.memory_space<vmem>>, vector<1x32xf32>
    %4 = vector.broadcast %3 : vector<1x32xf32> to vector<16x32xf32>
    %5 = arith.addf %2, %4 : vector<16x32xf32>
    %c0_5 = arith.constant 0 : index
    %c0_6 = arith.constant 0 : index
    %6 = vector.load %arg4[%c0_5, %c0_6] : memref<16x32xf32, #tpu.memory_space<vmem>>, vector<16x32xf32>
    tpu.vector_store %arg4[%c0_5, %c0_6], %5 {strides = array<i32>} : memref<16x32xf32, #tpu.memory_space<vmem>>, vector<16x32xf32>,
    return
  }
  func.func @transform_0(%arg0: i32) -> (i32, i32) {
    %c0_i32 = arith.constant 0 : i32
    %c0_i32_0 = arith.constant 0 : i32
    return %arg0, %c0_i32 : i32, i32
  }
  func.func @transform_1(%arg0: i32) -> (i32, i32) {
    %c0_i32 = arith.constant 0 : i32
    %c0_i32_0 = arith.constant 0 : i32
    %c0_i32_1 = arith.constant 0 : i32
    return %c0_i32, %c0_i32_0 : i32, i32
  }
  func.func @transform_2(%arg0: i32) -> (i32, i32) {
    %c0_i32 = arith.constant 0 : i32
    %c0_i32_0 = arith.constant 0 : i32
    %c0_i32_1 = arith.constant 0 : i32
    return %c0_i32, %c0_i32_0 : i32, i32
  }
  func.func @transform_3(%arg0: i32) -> (i32, i32) {
    %c0_i32 = arith.constant 0 : i32
    %c0_i32_0 = arith.constant 0 : i32
    return %arg0, %c0_i32 : i32, i32
  }
}

module attributes {stable_mosaic.version = 11 : i64} {
  func.func @_patch_embed_kernel(%arg0: i32, %arg1: memref<16x32xf32, #tpu.memory_space<vmem>>, %arg2: memref<32x32xf32, #tpu.memory_space<vmem>>, %arg3: memref<1x32xf32, #tpu.memory_space<vmem>>, %arg4: memref<16x32xf32, #tpu.memory_space<vmem>>) attributes {dimension_semantics = [#tpu.dimension_semantics<parallel>], iteration_bounds = array<i64: 2>, scalar_prefetch = 0 : i64, scratch_operands = 0 : i64, tpu.core_type = #tpu.core_type<tc>, window_params = [{transform_indices = @transform_0, window_bounds = array<i64: 16, 32>}, {pipeline_mode = #tpu.pipeline_mode<synchronous>, transform_indices = @transform_1, window_bounds = array<i64: 32, 32>}, {pipeline_mode = #tpu.pipeline_mode<synchronous>, transform_indices = @transform_2, window_bounds = array<i64: 1, 32>}, {transform_indices = @transform_3, window_bounds = array<i64: 16, 32>}]} {
    %c0 = arith.constant 0 : index
    %c0_0 = arith.constant 0 : index
    %0 = vector.load %arg1[%c0, %c0_0] : memref<16x32xf32, #tpu.memory_space<vmem>>, vector<16x32xf32>
    %c0_1 = arith.constant 0 : index
    %c0_2 = arith.constant 0 : index
    %1 = vector.load %arg2[%c0_1, %c0_2] : memref<32x32xf32, #tpu.memory_space<vmem>>, vector<32x32xf32>
    %cst = arith.constant dense<0.000000e+00> : vector<16x32xf32>
    %2 = tpu.matmul %0, %1, %cst {dimension_numbers = #tpu.dot_dimension_numbers<[1], [0], [0], [1], [0, 0, 1, 1], [], []>} : vector<16x32xf32>, vector<32x32xf32>, vector<16x32xf32> -> vector<16x32xf32>
    %c0_3 = arith.constant 0 : index
    %c0_4 = arith.constant 0 : index
    %3 = vector.load %arg3[%c0_3, %c0_4] : memref<1x32xf32, #tpu.memory_space<vmem>>, vector<1x32xf32>
    %4 = vector.broadcast %3 : vector<1x32xf32> to vector<16x32xf32>
    %5 = arith.addf %2, %4 : vector<16x32xf32>
    %c0_5 = arith.constant 0 : index
    %c0_6 = arith.constant 0 : index
    %6 = vector.load %arg4[%c0_5, %c0_6] : memref<16x32xf32, #tpu.memory_space<vmem>>, vector<16x32xf32>
    tpu.vector_store %arg4[%c0_5, %c0_6], %5 {strides = array<i32>} : memref<16x32xf32, #tpu.memory_space<vmem>>, vector<16x32xf32>,
    return
  }
  func.func @transform_0(%arg0: i32) -> (i32, i32) {
    %c0_i32 = arith.constant 0 : i32
    %c0_i32_0 = arith.constant 0 : i32
    return %arg0, %c0_i32 : i32, i32
  }
  func.func @transform_1(%arg0: i32) -> (i32, i32) {
    %c0_i32 = arith.constant 0 : i32
    %c0_i32_0 = arith.constant 0 : i32
    %c0_i32_1 = arith.constant 0 : i32
    return %c0_i32, %c0_i32_0 : i32, i32
  }
  func.func @transform_2(%arg0: i32) -> (i32, i32) {
    %c0_i32 = arith.constant 0 : i32
    %c0_i32_0 = arith.constant 0 : i32
    %c0_i32_1 = arith.constant 0 : i32
    return %c0_i32, %c0_i32_0 : i32, i32
  }
  func.func @transform_3(%arg0: i32) -> (i32, i32) {
    %c0_i32 = arith.constant 0 : i32
    %c0_i32_0 = arith.constant 0 : i32
    return %arg0, %c0_i32 : i32, i32
  }
}

</mosaic_0001>

<bundles_post_ra>
// kernel: tpu_custom_call.1
= control target key start
LH: loop header
LB: loop body
LE: loop exit
PB: predicated region body
PF: predicated region fallthrough
CT: control target
= control target key end

     0   :  { %8 = vsyncpa [#allocation3], 0  ;;  %s906_s0 = inlined_call_operand.hbm [shape: f32[22,32], index: 0, kind: input, shape index: {}]   ;;  %s907_s1 = inlined_call_operand.hbm [shape: f32[32,32], index: 1, kind: input, shape index: {}]   ;;  %s908_s2 = inlined_call_operand.vmem [shape: f32[1,32], index: 2, kind: input, shape index: {}]   ;;  %s909_s3 = inlined_call_operand.hbm [shape: f32[22,32], index: 3, kind: output, shape index: {}]  }
   0x1   :  { %10 = vsyncpa [#allocation3 + $0x1], 0 }
   0x2   :  { %11 = vsyncpa [#allocation6], 0 }
   0x3   :  { %12 = vsyncpa [#allocation4], 0 }
   0x4   :  { %14 = vsyncpa [#allocation4 + $0x1], 0  ;;  %s687_s12 = smov 0   ;;  %s689_s13 = smov 0  }
   0x5   :  { %s691_s14 = smov 0   ;;  %s693_s15 = smov 0  }
   0x6 LB: > { %s708_s16 = sadd.s32 4294967295, %s656_s15   ;;  %s420_s17 = sadd.s32 4294967294, %s656_s15   ;;  %s656_s15 = sphi %s693_s15, %s929_s15   ;;  %s652_s14 = sphi %s691_s14, %s928_s14   ;;  %s648_s13 = sphi %s689_s13, %s927_s13   ;;  %s644_s12 = sphi %s687_s12, %s926_s12  }
   0x7   : > { %s712_s18 = sadd.s32 1, %s656_s15   ;;  %s27_s19 = sadd.s32 1, %s652_s14 }
   0x8   : > { %s24_s20 = ssub.s32 %s656_s15, %s712_s18  ;;  %p34_p0 = scmp.ne.s32.totalorder %s652_s14, %s648_s13 }
   0x9   : > { %p25_p1 = scmp.eq.s32.totalorder %s24_s20, 0  ;;  %p35_p2 = scmp.eq.s32.totalorder %s656_s15, 0 }
   0xa   : > { %p40_p3 = scmp.ne.s32.totalorder %s648_s13, %s644_s12  ;;  %p910_p4 = scmp.eq.s32.totalorder %s708_s16, 0 }
   0xb   : > { %s724_s21 = scalar_select %p25_p1, %s652_s14, %s27_s19  }
   0xc   : > { %p726_p5 = por %p35_p2, %p34_p0  ;;  %p732_p6 = por %p910_p4, %p40_p3 }
   0xd   : > { %p106_p7 = scmp.eq.s32.totalorder %s708_s16, 1  ;;  %p112_p8 = scmp.eq.s32.totalorder %s420_s17, 1 }
   0xe   : > { %s913_s22 = scalar_select %p726_p5, 1, 0 }
   0xf   : > { %s914_s23 = scalar_select %p732_p6, 1, 0 }
  0x10   : > { %p421_p9 = scmp.ge.s32.totalorder %s656_s15, 1  ;;  %p119_p10 = scmp.lt.s32.totalorder %s656_s15, 3 }
  0x11   : > { %p739_p11 = por %p106_p7, %p34_p0  ;;  %p743_p12 = por %p112_p8, %p40_p3 }
  0x12   : > { %p747_p13 = pnand %p421_p9, %p119_p10  ;;  %s658_s27 = smov [#allocation5]  }
  0x13   : > { %s915_s24 = scalar_select %p739_p11, 1, 0 }
  0x14   : > { %s916_s25 = scalar_select %p743_p12, 1, 0 }
  0x15   : > { %s917_s26 = scalar_select %p747_p13, 1, 0 }
  0x16   : > { %p480_p1 = pneg %p747_p13  ;;  %s131_s28 = sshll.u32 %s658_s27, 4  ;;  %s132_s28 = int_to_ptr.vmem [resolvable:$true] %s131_s28 }
  0x17   : > { %s530_s5 = scalar_lea.hbm %s907_s1, 512 }
  0x18   : > { %p755_p2 = pnand %p480_p1, %p910_p4  ;;  %p531_p0 = scmp.ne.s32.totalorder %s907_s1, %s530_s5 }
  0x19   : > { %p537_p9 = scmp.lt.u32.totalorder %s530_s5, %s907_s1 }
  0x1a   : > { %p532_p3 = pneg %p755_p2 }
  0x1c   : > { %p533_p7 = pnand %p532_p3, %p531_p0 }
  0x1e   : > { %p534_p8 = pneg %p533_p7 }
  0x20   : > { %p539_p10 = pnand %p537_p9, %p534_p8 }
  0x22   : > { %542 = shalt.err (!%p539_p10)
}
  0x23   : > { %s543_s10 = scalar_lea.vmem %s132_s28, 512  ;;  %p551_p11 = scmp.lt.s32.totalorder %s132_s28, %s132_s28 }
  0x24   : > { %p544_p1 = scmp.ne.s32.totalorder %s132_s28, %s543_s10  ;;  %p552_p6 = scmp.lt.s32.totalorder %s543_s10, %s543_s10 }
  0x26   : > { %p546_p4 = pnand %p544_p1, %p532_p3  ;;  %p553_p13 = por %p552_p6, %p551_p11 }
  0x28   : > { %p547_p12 = pneg %p546_p4 }
  0x2a   : > { %p554_p5 = pnand %p553_p13, %p547_p12 }
  0x2c   : > { %557 = shalt.err (!%p554_p5)
}
  0x2d   : > { %s659_s11 = smov 128   ;;  %s660_s17 = smov 8  }
  0x2e   : > { %483 = dma.hbm_to_vmem [thread:$0]  (!%p755_p2), %s907_s1, 512, %s132_s28, [#allocation6], %s659_s11, %s659_s11, %s660_s17  }
  0x2f   : > { %p423_p0 = scmp.ge.s32.totalorder %s656_s15, 2 }
  0x30   : > { %p919_p4 = scmp.ne.s32.totalorder (!%p423_p0), %s913_s22, 0 }
  0x31   : > { %144 = sbr.rel (%p423_p0) target bundleno = 91 (0x5b), region = 24 }
  0x38   : > { %147 = sbr.rel (!%p919_p4) target bundleno = 91 (0x5b), region = 28  ;;  %s148_s27 = sand.u32 (%p919_p4), 1, %s652_s14  }
  0x39   : > { %s425_s30 = sshll.u32 (%p919_p4), %s656_s15, 1  ;;  %s424_s4 = sshll.u32 (%p919_p4), %s148_s27, 4 }
  0x3a   : > { %s154_s5 = ssub.s32 (%p919_p4), 3, %s425_s30  ;;  %s785_s6 = scalar_lea.sflag (%p919_p4), [#allocation3], %s148_s27 }
  0x3b   : > { %p155_p5 = scmp.lt.s32.totalorder (%p919_p4), %s154_s5, 2  ;;  %s152_s7 = scalar_lea.vmem (%p919_p4), [#allocation2], %s424_s4 }
  0x3f   : > { %s931_s5 = smov (!%p155_p5, %s154_s5), 2 }
  0x40   : > { %s782_s29 = sshll.u32 %s931_s5, 7 }
  0x41   : > { %s159_s28 = ssub.s32 256, %s782_s29 }
  0x42   : > { %160 = vsyncadd %s785_s6, %s159_s28  ;;  %p427_p6 = scmp.ne.s32.totalorder %s782_s29, 0  ;;  %s447_s22 = sshll.u32 %s656_s15, 8 }
  0x43   : > { %s793_s10 = scalar_lea.hbm %s906_s0, %s447_s22  ;;  %s165_s11 = sshll.u32 %s152_s7, 4  ;;  %s795_s11 = int_to_ptr.vmem [resolvable:$true] %s165_s11 }
  0x44   : > { %s558_s17 = scalar_lea.hbm %s793_s10, %s782_s29  ;;  %s562_s27 = scalar_lea.hbm %s906_s0, 384 }
  0x45   : > { %p559_p11 = scmp.ne.s32.totalorder %s793_s10, %s558_s17  ;;  %p563_p2 = scmp.lt.u32.totalorder %s793_s10, %s906_s0 }
  0x46   : > { %p564_p3 = scmp.lt.u32.totalorder %s562_s27, %s558_s17  ;;  %p566_p8 = scmp.lt.u32.totalorder %s558_s17, %s793_s10 }
  0x47   : > { %p560_p12 = pnand %p559_p11, %p427_p6 }
  0x48   : > { %p565_p7 = por %p564_p3, %p563_p2 }
  0x49   : > { %p561_p13 = pneg %p560_p12 }
  0x4a   : > { %p567_p9 = por %p566_p8, %p565_p7 }
  0x4c   : > { %p568_p10 = pnand %p567_p9, %p561_p13 }
  0x4e   : > { %571 = shalt.err (!%p568_p10)
}
  0x4f   : > { %s572_s5 = scalar_lea.vmem %s795_s11, %s782_s29  ;;  %s661_s28 = smov [#allocation2]  }
  0x50   : > { %p573_p1 = scmp.ne.s32.totalorder %s795_s11, %s572_s5  ;;  %s576_s7 = sshll.u32 %s661_s28, 4  ;;  %s577_s7 = int_to_ptr.vmem [resolvable:$false] %s576_s7 }
  0x51   : > { %s578_s22 = scalar_lea.vmem %s577_s7, 512  ;;  %p579_p11 = scmp.lt.s32.totalorder %s795_s11, %s577_s7 }
  0x52   : > { %p574_p4 = pnand %p573_p1, %p427_p6  ;;  %p580_p12 = scmp.lt.s32.totalorder %s578_s22, %s572_s5 }
  0x54   : > { %p575_p5 = pneg %p574_p4  ;;  %p581_p2 = por %p580_p12, %p579_p11 }
  0x56   : > { %p582_p3 = pnand %p581_p2, %p575_p5 }
  0x58   : > { %585 = shalt.err (!%p582_p3)
}
  0x59   : > { %s662_s8 = smov 128   ;;  %s663_s9 = smov 8  }
  0x5a   : > { %171 = dma.hbm_to_vmem [thread:$0]  (%p427_p6), %s793_s10, %s782_s29, %s795_s11, %s785_s6, %s662_s8, %s662_s8, %s663_s9  }
  0x5b PF: > { %p920_p13 = scmp.ne.s32.totalorder %s917_s26, 0 }
  0x5c   : > { %s825_s17 = sand.u32 (!%p920_p13), 1, %s648_s13   ;;  %p921_p7 = scmp.ne.s32.totalorder (!%p920_p13), %s914_s23, 0 }
  0x5d   : > { %177 = sbr.rel (%p920_p13) target bundleno = 359 (0x167), region = 32  ;;  %s432_s19 = sshll.u32 (!%p920_p13), %s825_s17, 4 }
  0x5e   : > { %s180_s20 = scalar_lea.sflag (!%p920_p13), [#allocation3], %s825_s17  ;;  %s183_s27 = scalar_lea.vmem (!%p920_p13), [#allocation2], %s432_s19 }
  0x64   : > { %631 = dma.done.wait (%p921_p7), %s180_s20, 256  }
  0x65   : > { %633 = vsyncadd (%p921_p7), %s180_s20, 4294967040  ;;  %p922_p6 = scmp.eq.s32.totalorder %s708_s16, 0 }
  0x67   : > { %635 = dma.done.wait (%p922_p6), [#allocation6], 512   ;;  %p923_p8 = pmov %p922_p6 }
  0x68   : > { %vm233_vm0 = vcmask 261120   ;;  %v222_v0 = vld [vmem:[#allocation5] sm:$0xff]  ;;  %v223_v1 = vld [vmem:[#allocation5 + $0x8] sm:$0xff]  ;;  %v224_v2 = vld [vmem:[#allocation5 + $0x10] sm:$0xff]  ;;  %s209_s29 = scalar_lea.vmem [#allocation7], %s432_s19  ;;  %s318_s6 = scalar_lea.sflag [#allocation4], %s825_s17 }
  0x69   : > { %637 = vsyncadd (%p923_p8), [#allocation6], 4294966784  ;;  %v466_v3 = vpack.c.bf16 %v223_v1, %v222_v0  ;;  %v225_v4 = vld [vmem:[#allocation5 + $0x18] sm:$0xff]  ;;  %v220_v5 = vld [vmem:[%s183_s27] sm:$0xff]  ;;  %p924_p9 = scmp.ne.s32.totalorder %s915_s24, 0 }
  0x6a   : > { %v470_v6 = vpack.c.bf16 %v225_v4, %v224_v2  ;;  %463 = vmatprep.mubr.msk.f32.mxu0 %vm233_vm0, %v220_v5  ;;  %v221_v7 = vld [vmem:[%s183_s27 + $0x8] sm:$0xff]  ;;  %v435_v8 = vld [vmem:[%s908_s2] ss:$0 sm:$0xff]  ;;  %s439_s10 = sshll.u32 (%p924_p9), %s708_s16, 1 }
  0x6b   : > { %467 = vmatprep.subr.bf16.mxu0 %v466_v3  ;;  %s326_s11 = ssub.s32 (%p924_p9), 3, %s439_s10 }
  0x6c   : > { %469 = vmatpush3.bf16.msra.mxu0 %v466_v3  ;;  %p327_p10 = scmp.lt.s32.totalorder (%p924_p9), %s326_s11, 2 }
  0x6d   : > { %471 = vmatprep.subr.bf16.mxu0 %v470_v6 }
  0x70   : > { %473 = vmatpush3.bf16.msra.mxu0 %v470_v6 }
  0x73   : > { %464 = vmatmul.mubr.msk.f32.vlgmr.msra.gmra.mrb[0].mxu0 %vm233_vm0, %v221_v7 }
 0x144   : > { %324 = sbr.rel (!%p924_p9) target bundleno = 359 (0x167), region = 44 }
 0x146   : > { %v465_v9 = vpop.f32.mrb[0].mxu0 }
 0x147   : > { %v312_v10 = vadd.f32 %v465_v9, %v435_v8  ;;  %v306_v11 = vpop.f32.mrb[1].mxu0 }
 0x148   : > { %v307_v12 = vadd.f32 %v435_v8, %v306_v11 }
 0x149   : > { %316 = vst.msk [vmem:[%s209_s29 + $0x8] sm:$0xff] %vm233_vm0, %v312_v10 }
 0x14a   : > { %315 = vst.msk [vmem:[%s209_s29] sm:$0xff] %vm233_vm0, %v307_v12 }
 0x14b   : > { %s933_s11 = smov (!%p327_p10, %s326_s11), 2 }
 0x14c   : > { %s848_s30 = sshll.u32 %s933_s11, 7 }
 0x14d   : > { %s331_s4 = ssub.s32 256, %s848_s30 }
 0x14e   : > { %332 = vsyncadd %s318_s6, %s331_s4  ;;  %p441_p1 = scmp.ne.s32.totalorder %s848_s30, 0  ;;  %s448_s5 = sshll.u32 %s708_s16, 8 }
 0x14f   : > { %s858_s7 = scalar_lea.hbm %s909_s3, %s448_s5  ;;  %s337_s22 = sshll.u32 %s209_s29, 4  ;;  %s860_s22 = int_to_ptr.vmem [resolvable:$true] %s337_s22 }
 0x150   : > { %s586_s8 = scalar_lea.vmem %s860_s22, %s848_s30  ;;  %s664_s9 = smov [#allocation7]  }
 0x151   : > { %p587_p4 = scmp.ne.s32.totalorder %s860_s22, %s586_s8  ;;  %s590_s19 = sshll.u32 %s664_s9, 4  ;;  %s591_s19 = int_to_ptr.vmem [resolvable:$false] %s590_s19 }
 0x152   : > { %s592_s16 = scalar_lea.vmem %s591_s19, 512  ;;  %p593_p12 = scmp.lt.s32.totalorder %s860_s22, %s591_s19 }
 0x153   : > { %p588_p5 = pnand %p587_p4, %p441_p1  ;;  %p594_p2 = scmp.lt.s32.totalorder %s592_s16, %s586_s8 }
 0x155   : > { %p589_p11 = pneg %p588_p5  ;;  %p595_p3 = por %p594_p2, %p593_p12 }
 0x157   : > { %p596_p13 = pnand %p595_p3, %p589_p11 }
 0x159   : > { %599 = shalt.err (!%p596_p13)
}
 0x15a   : > { %s600_s20 = scalar_lea.hbm %s858_s7, %s848_s30  ;;  %s604_s26 = scalar_lea.hbm %s909_s3, 384 }
 0x15b   : > { %p601_p7 = scmp.ne.s32.totalorder %s858_s7, %s600_s20  ;;  %p605_p9 = scmp.lt.u32.totalorder %s858_s7, %s909_s3 }
 0x15c   : > { %p606_p10 = scmp.lt.u32.totalorder %s604_s26, %s600_s20  ;;  %p608_p5 = scmp.lt.u32.totalorder %s600_s20, %s858_s7 }
 0x15d   : > { %p602_p6 = pnand %p601_p7, %p441_p1 }
 0x15e   : > { %p607_p4 = por %p606_p10, %p605_p9 }
 0x15f   : > { %p603_p8 = pneg %p602_p6 }
 0x160   : > { %p609_p11 = por %p608_p5, %p607_p4 }
 0x162   : > { %p610_p12 = pnand %p609_p11, %p603_p8 }
 0x164   : > { %613 = shalt.err (!%p610_p12)
}
 0x165   : > { %s665_s11 = smov 128   ;;  %s666_s4 = smov 8  }
 0x166   : > { %343 = dma.vmem_to_hbm [thread:$0]  (%p441_p1), %s860_s22, %s848_s30, %s858_s7, %s318_s6, %s665_s11, %s665_s11, %s666_s4  }
 0x167 PF: > { %s352_s5 = sand.u32 1, %s644_s12   ;;  %p925_p2 = scmp.ne.s32.totalorder %s916_s25, 0 }
 0x168   : > { %s353_s24 = scalar_lea.sflag [#allocation4], %s352_s5 }
 0x169   : > { %p485_p3 = pnand %p423_p0, %p925_p2 }
 0x16b   : > { %639 = dma.done.wait (!%p485_p3), %s353_s24, 256  }
 0x16c   : > { %641 = vsyncadd (!%p485_p3), %s353_s24, 4294967040  ;;  %p17_p13 = scmp.ge.s32.totalorder %s712_s18, 4   ;;  %s926_s12 = smov %s648_s13 }
 0x16d   : > { %s927_s13 = smov %s652_s14  ;;  %s928_s14 = smov %s724_s21 }
 0x16e   : > { %s929_s15 = smov %s712_s18  ;;  %19 = sbr.rel (!%p17_p13) target bundleno = 6 (0x6), region = 81 }
 0x175   :  { %358 = vsyncpa [#allocation3], 1 }
 0x176   :  { %360 = vsyncpa [#allocation3 + $0x1], 1 }
 0x177   :  { %361 = vsyncpa [#allocation6], 1 }
 0x178   :  { %362 = vsyncpa [#allocation4], 1 }
 0x179   :  { %364 = vsyncpa [#allocation4 + $0x1], 1 }

// kernel: tpu_custom_call.1
= control target key start
LH: loop header
LB: loop body
LE: loop exit
PB: predicated region body
PF: predicated region fallthrough
CT: control target
= control target key end

     0   :  { %8 = vsyncpa [#allocation3], 0  ;;  %s906_s0 = inlined_call_operand.hbm [shape: f32[22,32], index: 0, kind: input, shape index: {}]   ;;  %s907_s1 = inlined_call_operand.hbm [shape: f32[32,32], index: 1, kind: input, shape index: {}]   ;;  %s908_s2 = inlined_call_operand.vmem [shape: f32[1,32], index: 2, kind: input, shape index: {}]   ;;  %s909_s3 = inlined_call_operand.hbm [shape: f32[22,32], index: 3, kind: output, shape index: {}]  }
   0x1   :  { %10 = vsyncpa [#allocation3 + $0x1], 0 }
   0x2   :  { %11 = vsyncpa [#allocation6], 0 }
   0x3   :  { %12 = vsyncpa [#allocation4], 0 }
   0x4   :  { %14 = vsyncpa [#allocation4 + $0x1], 0  ;;  %s687_s12 = smov 0   ;;  %s689_s13 = smov 0  }
   0x5   :  { %s691_s14 = smov 0   ;;  %s693_s15 = smov 0  }
   0x6 LB: > { %s708_s16 = sadd.s32 4294967295, %s656_s15   ;;  %s420_s17 = sadd.s32 4294967294, %s656_s15   ;;  %s656_s15 = sphi %s693_s15, %s929_s15   ;;  %s652_s14 = sphi %s691_s14, %s928_s14   ;;  %s648_s13 = sphi %s689_s13, %s927_s13   ;;  %s644_s12 = sphi %s687_s12, %s926_s12  }
   0x7   : > { %s712_s18 = sadd.s32 1, %s656_s15   ;;  %s27_s19 = sadd.s32 1, %s652_s14 }
   0x8   : > { %s24_s20 = ssub.s32 %s656_s15, %s712_s18  ;;  %p34_p0 = scmp.ne.s32.totalorder %s652_s14, %s648_s13 }
   0x9   : > { %p25_p1 = scmp.eq.s32.totalorder %s24_s20, 0  ;;  %p35_p2 = scmp.eq.s32.totalorder %s656_s15, 0 }
   0xa   : > { %p40_p3 = scmp.ne.s32.totalorder %s648_s13, %s644_s12  ;;  %p910_p4 = scmp.eq.s32.totalorder %s708_s16, 0 }
   0xb   : > { %s724_s21 = scalar_select %p25_p1, %s652_s14, %s27_s19  }
   0xc   : > { %p726_p5 = por %p35_p2, %p34_p0  ;;  %p732_p6 = por %p910_p4, %p40_p3 }
   0xd   : > { %p106_p7 = scmp.eq.s32.totalorder %s708_s16, 1  ;;  %p112_p8 = scmp.eq.s32.totalorder %s420_s17, 1 }
   0xe   : > { %s913_s22 = scalar_select %p726_p5, 1, 0 }
   0xf   : > { %s914_s23 = scalar_select %p732_p6, 1, 0 }
  0x10   : > { %p421_p9 = scmp.ge.s32.totalorder %s656_s15, 1  ;;  %p119_p10 = scmp.lt.s32.totalorder %s656_s15, 3 }
  0x11   : > { %p739_p11 = por %p106_p7, %p34_p0  ;;  %p743_p12 = por %p112_p8, %p40_p3 }
  0x12   : > { %p747_p13 = pnand %p421_p9, %p119_p10  ;;  %s658_s27 = smov [#allocation5]  }
  0x13   : > { %s915_s24 = scalar_select %p739_p11, 1, 0 }
  0x14   : > { %s916_s25 = scalar_select %p743_p12, 1, 0 }
  0x15   : > { %s917_s26 = scalar_select %p747_p13, 1, 0 }
  0x16   : > { %p480_p1 = pneg %p747_p13  ;;  %s131_s28 = sshll.u32 %s658_s27, 4  ;;  %s132_s28 = int_to_ptr.vmem [resolvable:$true] %s131_s28 }
  0x17   : > { %s530_s5 = scalar_lea.hbm %s907_s1, 512 }
  0x18   : > { %p755_p2 = pnand %p480_p1, %p910_p4  ;;  %p531_p0 = scmp.ne.s32.totalorder %s907_s1, %s530_s5 }
  0x19   : > { %p537_p9 = scmp.lt.u32.totalorder %s530_s5, %s907_s1 }
  0x1a   : > { %p532_p3 = pneg %p755_p2 }
  0x1c   : > { %p533_p7 = pnand %p532_p3, %p531_p0 }
  0x1e   : > { %p534_p8 = pneg %p533_p7 }
  0x20   : > { %p539_p10 = pnand %p537_p9, %p534_p8 }
  0x22   : > { %542 = shalt.err (!%p539_p10)
}
  0x23   : > { %s543_s10 = scalar_lea.vmem %s132_s28, 512  ;;  %p551_p11 = scmp.lt.s32.totalorder %s132_s28, %s132_s28 }
  0x24   : > { %p544_p1 = scmp.ne.s32.totalorder %s132_s28, %s543_s10  ;;  %p552_p6 = scmp.lt.s32.totalorder %s543_s10, %s543_s10 }
  0x26   : > { %p546_p4 = pnand %p544_p1, %p532_p3  ;;  %p553_p13 = por %p552_p6, %p551_p11 }
  0x28   : > { %p547_p12 = pneg %p546_p4 }
  0x2a   : > { %p554_p5 = pnand %p553_p13, %p547_p12 }
  0x2c   : > { %557 = shalt.err (!%p554_p5)
}
  0x2d   : > { %s659_s11 = smov 128   ;;  %s660_s17 = smov 8  }
  0x2e   : > { %483 = dma.hbm_to_vmem [thread:$0]  (!%p755_p2), %s907_s1, 512, %s132_s28, [#allocation6], %s659_s11, %s659_s11, %s660_s17  }
  0x2f   : > { %p423_p0 = scmp.ge.s32.totalorder %s656_s15, 2 }
  0x30   : > { %p919_p4 = scmp.ne.s32.totalorder (!%p423_p0), %s913_s22, 0 }
  0x31   : > { %144 = sbr.rel (%p423_p0) target bundleno = 91 (0x5b), region = 24 }
  0x38   : > { %147 = sbr.rel (!%p919_p4) target bundleno = 91 (0x5b), region = 28  ;;  %s148_s27 = sand.u32 (%p919_p4), 1, %s652_s14  }
  0x39   : > { %s425_s30 = sshll.u32 (%p919_p4), %s656_s15, 1  ;;  %s424_s4 = sshll.u32 (%p919_p4), %s148_s27, 4 }
  0x3a   : > { %s154_s5 = ssub.s32 (%p919_p4), 3, %s425_s30  ;;  %s785_s6 = scalar_lea.sflag (%p919_p4), [#allocation3], %s148_s27 }
  0x3b   : > { %p155_p5 = scmp.lt.s32.totalorder (%p919_p4), %s154_s5, 2  ;;  %s152_s7 = scalar_lea.vmem (%p919_p4), [#allocation2], %s424_s4 }
  0x3f   : > { %s931_s5 = smov (!%p155_p5, %s154_s5), 2 }
  0x40   : > { %s782_s29 = sshll.u32 %s931_s5, 7 }
  0x41   : > { %s159_s28 = ssub.s32 256, %s782_s29 }
  0x42   : > { %160 = vsyncadd %s785_s6, %s159_s28  ;;  %p427_p6 = scmp.ne.s32.totalorder %s782_s29, 0  ;;  %s447_s22 = sshll.u32 %s656_s15, 8 }
  0x43   : > { %s793_s10 = scalar_lea.hbm %s906_s0, %s447_s22  ;;  %s165_s11 = sshll.u32 %s152_s7, 4  ;;  %s795_s11 = int_to_ptr.vmem [resolvable:$true] %s165_s11 }
  0x44   : > { %s558_s17 = scalar_lea.hbm %s793_s10, %s782_s29  ;;  %s562_s27 = scalar_lea.hbm %s906_s0, 384 }
  0x45   : > { %p559_p11 = scmp.ne.s32.totalorder %s793_s10, %s558_s17  ;;  %p563_p2 = scmp.lt.u32.totalorder %s793_s10, %s906_s0 }
  0x46   : > { %p564_p3 = scmp.lt.u32.totalorder %s562_s27, %s558_s17  ;;  %p566_p8 = scmp.lt.u32.totalorder %s558_s17, %s793_s10 }
  0x47   : > { %p560_p12 = pnand %p559_p11, %p427_p6 }
  0x48   : > { %p565_p7 = por %p564_p3, %p563_p2 }
  0x49   : > { %p561_p13 = pneg %p560_p12 }
  0x4a   : > { %p567_p9 = por %p566_p8, %p565_p7 }
  0x4c   : > { %p568_p10 = pnand %p567_p9, %p561_p13 }
  0x4e   : > { %571 = shalt.err (!%p568_p10)
}
  0x4f   : > { %s572_s5 = scalar_lea.vmem %s795_s11, %s782_s29  ;;  %s661_s28 = smov [#allocation2]  }
  0x50   : > { %p573_p1 = scmp.ne.s32.totalorder %s795_s11, %s572_s5  ;;  %s576_s7 = sshll.u32 %s661_s28, 4  ;;  %s577_s7 = int_to_ptr.vmem [resolvable:$false] %s576_s7 }
  0x51   : > { %s578_s22 = scalar_lea.vmem %s577_s7, 512  ;;  %p579_p11 = scmp.lt.s32.totalorder %s795_s11, %s577_s7 }
  0x52   : > { %p574_p4 = pnand %p573_p1, %p427_p6  ;;  %p580_p12 = scmp.lt.s32.totalorder %s578_s22, %s572_s5 }
  0x54   : > { %p575_p5 = pneg %p574_p4  ;;  %p581_p2 = por %p580_p12, %p579_p11 }
  0x56   : > { %p582_p3 = pnand %p581_p2, %p575_p5 }
  0x58   : > { %585 = shalt.err (!%p582_p3)
}
  0x59   : > { %s662_s8 = smov 128   ;;  %s663_s9 = smov 8  }
  0x5a   : > { %171 = dma.hbm_to_vmem [thread:$0]  (%p427_p6), %s793_s10, %s782_s29, %s795_s11, %s785_s6, %s662_s8, %s662_s8, %s663_s9  }
  0x5b PF: > { %p920_p13 = scmp.ne.s32.totalorder %s917_s26, 0 }
  0x5c   : > { %s825_s17 = sand.u32 (!%p920_p13), 1, %s648_s13   ;;  %p921_p7 = scmp.ne.s32.totalorder (!%p920_p13), %s914_s23, 0 }
  0x5d   : > { %177 = sbr.rel (%p920_p13) target bundleno = 359 (0x167), region = 32  ;;  %s432_s19 = sshll.u32 (!%p920_p13), %s825_s17, 4 }
  0x5e   : > { %s180_s20 = scalar_lea.sflag (!%p920_p13), [#allocation3], %s825_s17  ;;  %s183_s27 = scalar_lea.vmem (!%p920_p13), [#allocation2], %s432_s19 }
  0x64   : > { %631 = dma.done.wait (%p921_p7), %s180_s20, 256  }
  0x65   : > { %633 = vsyncadd (%p921_p7), %s180_s20, 4294967040  ;;  %p922_p6 = scmp.eq.s32.totalorder %s708_s16, 0 }
  0x67   : > { %635 = dma.done.wait (%p922_p6), [#allocation6], 512   ;;  %p923_p8 = pmov %p922_p6 }
  0x68   : > { %vm233_vm0 = vcmask 261120   ;;  %v222_v0 = vld [vmem:[#allocation5] sm:$0xff]  ;;  %v223_v1 = vld [vmem:[#allocation5 + $0x8] sm:$0xff]  ;;  %v224_v2 = vld [vmem:[#allocation5 + $0x10] sm:$0xff]  ;;  %s209_s29 = scalar_lea.vmem [#allocation7], %s432_s19  ;;  %s318_s6 = scalar_lea.sflag [#allocation4], %s825_s17 }
  0x69   : > { %637 = vsyncadd (%p923_p8), [#allocation6], 4294966784  ;;  %v466_v3 = vpack.c.bf16 %v223_v1, %v222_v0  ;;  %v225_v4 = vld [vmem:[#allocation5 + $0x18] sm:$0xff]  ;;  %v220_v5 = vld [vmem:[%s183_s27] sm:$0xff]  ;;  %p924_p9 = scmp.ne.s32.totalorder %s915_s24, 0 }
  0x6a   : > { %v470_v6 = vpack.c.bf16 %v225_v4, %v224_v2  ;;  %463 = vmatprep.mubr.msk.f32.mxu0 %vm233_vm0, %v220_v5  ;;  %v221_v7 = vld [vmem:[%s183_s27 + $0x8] sm:$0xff]  ;;  %v435_v8 = vld [vmem:[%s908_s2] ss:$0 sm:$0xff]  ;;  %s439_s10 = sshll.u32 (%p924_p9), %s708_s16, 1 }
  0x6b   : > { %467 = vmatprep.subr.bf16.mxu0 %v466_v3  ;;  %s326_s11 = ssub.s32 (%p924_p9), 3, %s439_s10 }
  0x6c   : > { %469 = vmatpush3.bf16.msra.mxu0 %v466_v3  ;;  %p327_p10 = scmp.lt.s32.totalorder (%p924_p9), %s326_s11, 2 }
  0x6d   : > { %471 = vmatprep.subr.bf16.mxu0 %v470_v6 }
  0x70   : > { %473 = vmatpush3.bf16.msra.mxu0 %v470_v6 }
  0x73   : > { %464 = vmatmul.mubr.msk.f32.vlgmr.msra.gmra.mrb[0].mxu0 %vm233_vm0, %v221_v7 }
 0x144   : > { %324 = sbr.rel (!%p924_p9) target bundleno = 359 (0x167), region = 44 }
 0x146   : > { %v465_v9 = vpop.f32.mrb[0].mxu0 }
 0x147   : > { %v312_v10 = vadd.f32 %v465_v9, %v435_v8  ;;  %v306_v11 = vpop.f32.mrb[1].mxu0 }
 0x148   : > { %v307_v12 = vadd.f32 %v435_v8, %v306_v11 }
 0x149   : > { %316 = vst.msk [vmem:[%s209_s29 + $0x8] sm:$0xff] %vm233_vm0, %v312_v10 }
 0x14a   : > { %315 = vst.msk [vmem:[%s209_s29] sm:$0xff] %vm233_vm0, %v307_v12 }
 0x14b   : > { %s933_s11 = smov (!%p327_p10, %s326_s11), 2 }
 0x14c   : > { %s848_s30 = sshll.u32 %s933_s11, 7 }
 0x14d   : > { %s331_s4 = ssub.s32 256, %s848_s30 }
 0x14e   : > { %332 = vsyncadd %s318_s6, %s331_s4  ;;  %p441_p1 = scmp.ne.s32.totalorder %s848_s30, 0  ;;  %s448_s5 = sshll.u32 %s708_s16, 8 }
 0x14f   : > { %s858_s7 = scalar_lea.hbm %s909_s3, %s448_s5  ;;  %s337_s22 = sshll.u32 %s209_s29, 4  ;;  %s860_s22 = int_to_ptr.vmem [resolvable:$true] %s337_s22 }
 0x150   : > { %s586_s8 = scalar_lea.vmem %s860_s22, %s848_s30  ;;  %s664_s9 = smov [#allocation7]  }
 0x151   : > { %p587_p4 = scmp.ne.s32.totalorder %s860_s22, %s586_s8  ;;  %s590_s19 = sshll.u32 %s664_s9, 4  ;;  %s591_s19 = int_to_ptr.vmem [resolvable:$false] %s590_s19 }
 0x152   : > { %s592_s16 = scalar_lea.vmem %s591_s19, 512  ;;  %p593_p12 = scmp.lt.s32.totalorder %s860_s22, %s591_s19 }
 0x153   : > { %p588_p5 = pnand %p587_p4, %p441_p1  ;;  %p594_p2 = scmp.lt.s32.totalorder %s592_s16, %s586_s8 }
 0x155   : > { %p589_p11 = pneg %p588_p5  ;;  %p595_p3 = por %p594_p2, %p593_p12 }
 0x157   : > { %p596_p13 = pnand %p595_p3, %p589_p11 }
 0x159   : > { %599 = shalt.err (!%p596_p13)
}
 0x15a   : > { %s600_s20 = scalar_lea.hbm %s858_s7, %s848_s30  ;;  %s604_s26 = scalar_lea.hbm %s909_s3, 384 }
 0x15b   : > { %p601_p7 = scmp.ne.s32.totalorder %s858_s7, %s600_s20  ;;  %p605_p9 = scmp.lt.u32.totalorder %s858_s7, %s909_s3 }
 0x15c   : > { %p606_p10 = scmp.lt.u32.totalorder %s604_s26, %s600_s20  ;;  %p608_p5 = scmp.lt.u32.totalorder %s600_s20, %s858_s7 }
 0x15d   : > { %p602_p6 = pnand %p601_p7, %p441_p1 }
 0x15e   : > { %p607_p4 = por %p606_p10, %p605_p9 }
 0x15f   : > { %p603_p8 = pneg %p602_p6 }
 0x160   : > { %p609_p11 = por %p608_p5, %p607_p4 }
 0x162   : > { %p610_p12 = pnand %p609_p11, %p603_p8 }
 0x164   : > { %613 = shalt.err (!%p610_p12)
}
 0x165   : > { %s665_s11 = smov 128   ;;  %s666_s4 = smov 8  }
 0x166   : > { %343 = dma.vmem_to_hbm [thread:$0]  (%p441_p1), %s860_s22, %s848_s30, %s858_s7, %s318_s6, %s665_s11, %s665_s11, %s666_s4  }
 0x167 PF: > { %s352_s5 = sand.u32 1, %s644_s12   ;;  %p925_p2 = scmp.ne.s32.totalorder %s916_s25, 0 }
 0x168   : > { %s353_s24 = scalar_lea.sflag [#allocation4], %s352_s5 }
 0x169   : > { %p485_p3 = pnand %p423_p0, %p925_p2 }
 0x16b   : > { %639 = dma.done.wait (!%p485_p3), %s353_s24, 256  }
 0x16c   : > { %641 = vsyncadd (!%p485_p3), %s353_s24, 4294967040  ;;  %p17_p13 = scmp.ge.s32.totalorder %s712_s18, 4   ;;  %s926_s12 = smov %s648_s13 }
 0x16d   : > { %s927_s13 = smov %s652_s14  ;;  %s928_s14 = smov %s724_s21 }
 0x16e   : > { %s929_s15 = smov %s712_s18  ;;  %19 = sbr.rel (!%p17_p13) target bundleno = 6 (0x6), region = 81 }
 0x175   :  { %358 = vsyncpa [#allocation3], 1 }
 0x176   :  { %360 = vsyncpa [#allocation3 + $0x1], 1 }
 0x177   :  { %361 = vsyncpa [#allocation6], 1 }
 0x178   :  { %362 = vsyncpa [#allocation4], 1 }
 0x179   :  { %364 = vsyncpa [#allocation4 + $0x1], 1 }

</bundles_post_ra>
